<compile_context>
chip_gen: v5e
topology: v5e:2x2
jax: 0.10.0
libtpu: 0.0.40
codegen_flags: <defaults>
</compile_context>

<pallas_src>
import functools

import jax
import jax.numpy as jnp
from jax.experimental import pallas as pl
from jax.experimental.pallas import tpu as pltpu


_LANE = 128          # lane (last-dim) tile
_SUBLANE_F32 = 8     # sublane tile for f32 activations


def _round_up(n, m):
    return ((n + m - 1) // m) * m


# ----------------------------------------------------------------------------
# Generation detection (VMEM budget / number of TensorCores per device)
# ----------------------------------------------------------------------------
_GEN = None


def _tpu_generation():
    global _GEN
    if _GEN is None:
        try:
            kind = jax.devices()[0].device_kind.lower()
        except Exception:
            kind = ""
        if "v7" in kind:
            # 64 MiB VMEM per TC, 2 TCs per chip -> leave headroom.
            _GEN = {"num_tc": 2, "vmem_budget": 56 << 20}
        elif "v6" in kind:
            _GEN = {"num_tc": 1, "vmem_budget": 112 << 20}
        else:  # v5e / v5p / unknown: 128 MiB physical VMEM
            _GEN = {"num_tc": 1, "vmem_budget": 100 << 20}
    return _GEN


# ----------------------------------------------------------------------------
# One-time capability probe: is pipeline_mode=pl.Buffered(1) supported?
# (Single-buffered resident weights halve weight VMEM vs the default double
#  buffer.  Probe mirrors the real usage: constant index_map weight spec.)
# ----------------------------------------------------------------------------
_BUFFERED_OK = None


def _buffered_single_copy_supported():
    global _BUFFERED_OK
    if _BUFFERED_OK is not None:
        return _BUFFERED_OK

    def _probe_kernel(a_ref, w_ref, o_ref):
        o_ref[...] = a_ref[...] + w_ref[...]

    try:
        probe = pl.pallas_call(
            _probe_kernel,
            out_shape=jax.ShapeDtypeStruct((16, 128), jnp.float32),
            grid=(2,),
            in_specs=[
                pl.BlockSpec((8, 128), lambda i: (i, 0)),
                pl.BlockSpec((8, 128), lambda i: (0, 0),
                             pipeline_mode=pl.Buffered(1)),
            ],
            out_specs=pl.BlockSpec((8, 128), lambda i: (i, 0)),
        )
        jax.block_until_ready(
            probe(jnp.zeros((16, 128), jnp.float32),
                  jnp.zeros((8, 128), jnp.float32)))
        _BUFFERED_OK = True
    except Exception:
        _BUFFERED_OK = False
    return _BUFFERED_OK


# ----------------------------------------------------------------------------
# Kernels
# ----------------------------------------------------------------------------
def _mlp_decoder_kernel(x_ref, w1_ref, b1_ref, w2_ref, b2_ref, o_ref):
    """Fused  (x @ W1 + b1) -> ReLU -> (@ W2 + b2), whole weights resident."""
    x = x_ref[...].astype(jnp.bfloat16)                       # bf16 MXU inputs
    h = jnp.dot(x, w1_ref[...], preferred_element_type=jnp.float32)
    h = jnp.maximum(h + b1_ref[...], 0.0)                     # bias+ReLU on VPU (f32)
    y = jnp.dot(h.astype(jnp.bfloat16), w2_ref[...],
                preferred_element_type=jnp.float32)
    o_ref[...] = (y + b2_ref[...]).astype(o_ref.dtype)


def _mlp_decoder_tiled_kernel(x_ref, w1_ref, b1_ref, w2_ref, b2_ref, o_ref,
                              acc_ref):
    """Hidden-axis tiled variant: accumulate ReLU(x@W1[:,hk]+b1[hk]) @ W2[hk,:]
    over hidden tiles into an f32 accumulator (ReLU is per-hidden-column so
    splitting over hidden is exact)."""
    hk = pl.program_id(1)

    @pl.when(hk == 0)
    def _():
        acc_ref[...] = jnp.zeros_like(acc_ref)

    x = x_ref[...].astype(jnp.bfloat16)
    h = jnp.dot(x, w1_ref[...], preferred_element_type=jnp.float32)
    h = jnp.maximum(h + b1_ref[...], 0.0)
    acc_ref[...] += jnp.dot(h.astype(jnp.bfloat16), w2_ref[...],
                            preferred_element_type=jnp.float32)

    @pl.when(hk == pl.num_programs(1) - 1)
    def _():
        o_ref[...] = (acc_ref[...] + b2_ref[...]).astype(o_ref.dtype)


# ----------------------------------------------------------------------------
# Cached pallas_call builders
# ----------------------------------------------------------------------------
@functools.lru_cache(maxsize=None)
def _build_resident_call(B_pad, block_b, d_in_p, h_p, d_out_p,
                         x_dtype_name, out_dtype_name,
                         single_buffer_weights, vmem_limit):
    grid = (B_pad // block_b,)
    # Weights never change across the grid; single-buffer them when supported.
    weight_kw = ({"pipeline_mode": pl.Buffered(1)}
                 if single_buffer_weights else {})
    in_specs = [
        pl.BlockSpec((block_b, d_in_p), lambda i: (i, 0)),             # x tile
        pl.BlockSpec((d_in_p, h_p), lambda i: (0, 0), **weight_kw),    # W1 resident
        pl.BlockSpec((1, h_p), lambda i: (0, 0)),                      # b1
        pl.BlockSpec((h_p, d_out_p), lambda i: (0, 0), **weight_kw),   # W2 resident
        pl.BlockSpec((1, d_out_p), lambda i: (0, 0)),                  # b2
    ]
    out_spec = pl.BlockSpec((block_b, d_out_p), lambda i: (i, 0))

    x_bytes = jnp.dtype(x_dtype_name).itemsize
    out_dtype = jnp.dtype(out_dtype_name)
    flops = 2 * B_pad * (d_in_p * h_p + h_p * d_out_p)
    bytes_accessed = (B_pad * d_in_p * x_bytes
                      + (d_in_p * h_p + h_p * d_out_p) * 2
                      + (h_p + d_out_p) * 4
                      + B_pad * d_out_p * out_dtype.itemsize)

    return pl.pallas_call(
        _mlp_decoder_kernel,
        out_shape=jax.ShapeDtypeStruct((B_pad, d_out_p), out_dtype),
        grid_spec=pltpu.PrefetchScalarGridSpec(
            num_scalar_prefetch=0,
            grid=grid,
            in_specs=in_specs,
            out_specs=out_spec,
        ),
        compiler_params=pltpu.CompilerParams(
            dimension_semantics=("parallel",),       # batch tiles shard across TCs
            vmem_limit_bytes=int(vmem_limit),
        ),
        cost_estimate=pl.CostEstimate(
            flops=int(flops), transcendentals=0,
            bytes_accessed=int(bytes_accessed)),
    )


@functools.lru_cache(maxsize=None)
def _build_tiled_call(B_pad, block_b, d_in_p, h_p, d_out_p, block_h,
                      x_dtype_name, out_dtype_name, vmem_limit):
    grid = (B_pad // block_b, h_p // block_h)       # reduction (hidden) axis last
    in_specs = [
        pl.BlockSpec((block_b, d_in_p), lambda i, k: (i, 0)),     # x tile
        pl.BlockSpec((d_in_p, block_h), lambda i, k: (0, k)),     # W1 hidden tile
        pl.BlockSpec((1, block_h), lambda i, k: (0, k)),          # b1 hidden tile
        pl.BlockSpec((block_h, d_out_p), lambda i, k: (k, 0)),    # W2 hidden tile
        pl.BlockSpec((1, d_out_p), lambda i, k: (0, 0)),          # b2
    ]
    out_spec = pl.BlockSpec((block_b, d_out_p), lambda i, k: (i, 0))

    x_bytes = jnp.dtype(x_dtype_name).itemsize
    out_dtype = jnp.dtype(out_dtype_name)
    flops = 2 * B_pad * (d_in_p * h_p + h_p * d_out_p)
    bytes_accessed = (B_pad * d_in_p * x_bytes
                      + (B_pad // block_b) * (d_in_p * h_p + h_p * d_out_p) * 2
                      + (h_p + d_out_p) * 4
                      + B_pad * d_out_p * out_dtype.itemsize)

    return pl.pallas_call(
        _mlp_decoder_tiled_kernel,
        out_shape=jax.ShapeDtypeStruct((B_pad, d_out_p), out_dtype),
        grid_spec=pltpu.PrefetchScalarGridSpec(
            num_scalar_prefetch=0,
            grid=grid,
            in_specs=in_specs,
            out_specs=out_spec,
            scratch_shapes=[pltpu.VMEM((block_b, d_out_p), jnp.float32)],
        ),
        compiler_params=pltpu.CompilerParams(
            dimension_semantics=("parallel", "arbitrary"),
            vmem_limit_bytes=int(vmem_limit),
        ),
        cost_estimate=pl.CostEstimate(
            flops=int(flops), transcendentals=0,
            bytes_accessed=int(bytes_accessed)),
    )


# ----------------------------------------------------------------------------
# Tile-size heuristics (all trace-time Python over static shapes)
# ----------------------------------------------------------------------------
def _best_divisor_tile(B_sub, cap):
    """Largest multiple of the sublane tile <= cap that divides B_sub."""
    for t in range(cap, _SUBLANE_F32 - 1, -_SUBLANE_F32):
        if B_sub % t == 0:
            return t
    return None


def _choose_block_b(B, gen, *, cap, fixed_bytes, per_row_bytes, budget):
    B_sub = _round_up(B, _SUBLANE_F32)
    want = B_sub
    # Only force a split when there are multiple TensorCores to shard onto;
    # on 1-TC chips the grid is a serial loop and splitting just costs steps.
    if gen["num_tc"] > 1 and B_sub >= 2 * _SUBLANE_F32:
        want = _round_up(pl.cdiv(B_sub, gen["num_tc"]), _SUBLANE_F32)
    if want > cap:
        div = _best_divisor_tile(B_sub, cap)
        want = div if (div is not None and div >= cap // 2) else cap
    block_b = max(_SUBLANE_F32, want)
    # Shrink (halve) until the VMEM budget holds.
    while (block_b > _SUBLANE_F32
           and fixed_bytes + block_b * per_row_bytes > budget):
        block_b = max(_SUBLANE_F32, _round_up(block_b // 2, _SUBLANE_F32))
    return block_b


def _tiled_vmem_need(block_b, block_h, d_in_p, d_out_p, x_bytes, out_bytes):
    return (2 * ((d_in_p * block_h + block_h * d_out_p) * 2 + block_h * 4)
            + 2 * block_b * (d_in_p * x_bytes + d_out_p * out_bytes)
            + 2 * d_out_p * 4
            + block_b * d_out_p * 4          # f32 accumulator scratch
            + block_b * block_h * 6)         # f32 h + its bf16 copy


def _choose_block_h(h_p, fits):
    """Largest multiple of 128 that divides h_p and satisfies `fits`."""
    best = _LANE
    for c in range(_LANE, h_p + 1, _LANE):
        if h_p % c == 0 and fits(c):
            best = c
    return best


# ----------------------------------------------------------------------------
# Jitted forward (weights arrive pre-padded / pre-cast from __init__)
# ----------------------------------------------------------------------------
@functools.partial(jax.jit, static_argnames=("d_out", "single_buffer_weights"))
def _mlp_forward_impl(x, w1_p, b1_p, w2_p, b2_p, *, d_out,
                      single_buffer_weights):
    B, D_in = x.shape
    d_in_p, h_p = w1_p.shape
    d_out_p = w2_p.shape[1]
    out_dtype = x.dtype
    x_bytes = jnp.dtype(x.dtype).itemsize
    out_bytes = jnp.dtype(out_dtype).itemsize

    gen = _tpu_generation()
    budget = gen["vmem_budget"]
    cap = 512 if budget > (64 << 20) else 256

    w_copies = 1 if single_buffer_weights else 2
    weight_bytes = (d_in_p * h_p + h_p * d_out_p) * 2           # bf16
    fixed = w_copies * weight_bytes + 2 * (h_p + d_out_p) * 4   # + biases
    per_row = 2 * (d_in_p * x_bytes + d_out_p * out_bytes) + h_p * 6

    # Resident-weight path unless the weights can't (comfortably) live in VMEM.
    use_tiled = (fixed > int(0.6 * budget)
                 or fixed + _SUBLANE_F32 * per_row > budget)

    if not use_tiled:
        block_b = _choose_block_b(B, gen, cap=cap, fixed_bytes=fixed,
                                  per_row_bytes=per_row, budget=budget)
        B_pad = _round_up(B, block_b)
        vmem_need = fixed + block_b * per_row
        vmem_limit = min(max(int(1.25 * vmem_need), 16 << 20), budget)
        call = _build_resident_call(B_pad, block_b, d_in_p, h_p, d_out_p,
                                    str(x.dtype), str(out_dtype),
                                    single_buffer_weights, vmem_limit)
    else:
        # Hidden-axis weight tiling (v7x-sized decoders / 64 MiB per-TC VMEM).
        block_b = _choose_block_b(
            B, gen, cap=min(cap, 256),
            fixed_bytes=0,
            per_row_bytes=2 * (d_in_p * x_bytes + d_out_p * out_bytes)
            + d_out_p * 4,
            budget=budget)
        while True:
            fits = (lambda bh, bb=block_b: _tiled_vmem_need(
                bb, bh, d_in_p, d_out_p, x_bytes, out_bytes) <= budget)
            block_h = _choose_block_h(h_p, fits)
            if fits(block_h) or block_b <= _SUBLANE_F32:
                break
            block_b = max(_SUBLANE_F32, _round_up(block_b // 2, _SUBLANE_F32))
        B_pad = _round_up(B, block_b)
        vmem_need = _tiled_vmem_need(block_b, block_h, d_in_p, d_out_p,
                                     x_bytes, out_bytes)
        vmem_limit = min(max(int(1.25 * vmem_need), 16 << 20), budget)
        call = _build_tiled_call(B_pad, block_b, d_in_p, h_p, d_out_p, block_h,
                                 str(x.dtype), str(out_dtype), vmem_limit)

    # Only x is padded per call (weights were padded once in __init__).
    # TODO(synk): for very large B relative to the weights, pre-cast x to bf16
    # here to halve x DMA; not worth the wrapper round-trip at decoder-head B.
    if B_pad != B or d_in_p != D_in:
        x_p = jnp.pad(x, ((0, B_pad - B), (0, d_in_p - D_in)))
    else:
        x_p = x

    y_p = call(x_p, w1_p, b1_p, w2_p, b2_p)
    return y_p[:B, :d_out]


# ----------------------------------------------------------------------------
# Decoder wrapper mirroring the PyTorch dispatcher
# ----------------------------------------------------------------------------
class MLPDecoder:
    def __init__(self, params):
        d_in, hidden, d_out = params["d_in"], params["hidden"], params["d_out"]
        self.d_out = d_out

        # Deterministic parameter init (synthetic weights, not a checkpoint).
        k1, k2 = jax.random.split(jax.random.PRNGKey(42))
        # bf16 weight storage: native MXU dtype, half the DMA/VMEM of f32.
        # TODO(synk): v7x fp8(e4m3) weight path with per-channel scales would
        # halve weight bytes again; bf16 kept for v5e/v6e portability.
        self.w1 = (jax.random.normal(k1, (d_in, hidden), jnp.float32)
                   / jnp.sqrt(d_in)).astype(jnp.bfloat16)
        self.b1 = jnp.zeros((1, hidden), jnp.float32)
        self.w2 = (jax.random.normal(k2, (hidden, d_out), jnp.float32)
                   / jnp.sqrt(hidden)).astype(jnp.bfloat16)
        self.b2 = jnp.zeros((1, d_out), jnp.float32)

        # Pad feature dims to lane multiples ONCE here (not per forward call).
        d_in_p = _round_up(d_in, _LANE)
        h_p = _round_up(hidden, _LANE)
        d_out_p = _round_up(d_out, _LANE)
        self.w1_p = jnp.pad(self.w1, ((0, d_in_p - d_in), (0, h_p - hidden)))
        self.b1_p = jnp.pad(self.b1, ((0, 0), (0, h_p - hidden)))
        self.w2_p = jnp.pad(self.w2, ((0, h_p - hidden), (0, d_out_p - d_out)))
        self.b2_p = jnp.pad(self.b2, ((0, 0), (0, d_out_p - d_out)))

        # One-time capability probe, outside jit, cached module-wide.
        self._single_buffer_weights = _buffered_single_copy_supported()

    def __call__(self, x):
        return _mlp_forward_impl(
            x, self.w1_p, self.b1_p, self.w2_p, self.b2_p,
            d_out=self.d_out,
            single_buffer_weights=self._single_buffer_weights)


_DECODER_REGISTRY = {"MLPDecoder": MLPDecoder}


class Decoder:
    """Mirror of the PyTorch Decoder: resolves cfg['name'] -> concrete decoder."""
    # TODO(synk): original uses getattr(sys.modules[__name__], ...) over an
    # unspecified set of decoder classes; only MLPDecoder is provided here.

    def __init__(self, cfg):
        self.decoder = _DECODER_REGISTRY[cfg["name"]](cfg["params"])

    def forward(self, x):
        return self.decoder(x)


# ----------------------------------------------------------------------------
if __name__ == "__main__":
    cfg = {"name": "MLPDecoder",
           "params": {"d_in": 32, "hidden": 64, "d_out": 32}}
    decoder = Decoder(cfg)

    key = jax.random.PRNGKey(0)
    x = jax.random.normal(key, (8, 32), jnp.float32)   # (B, D_in)

    out = decoder.forward(x)
    out = jax.block_until_ready(out)

    # Pure-JAX reference mirroring the kernel's bf16-matmul / f32-accumulate path.
    d = decoder.decoder
    h_ref = jnp.dot(x.astype(jnp.bfloat16), d.w1,
                    preferred_element_type=jnp.float32) + d.b1
    h_ref = jnp.maximum(h_ref, 0.0)
    ref = jnp.dot(h_ref.astype(jnp.bfloat16), d.w2,
                  preferred_element_type=jnp.float32) + d.b2

    assert out.shape == (8, 32)
    assert out.dtype == x.dtype
    assert jnp.allclose(out, ref, atol=2e-2, rtol=2e-2), (
        float(jnp.max(jnp.abs(out - ref))))

    print("KERNEL_OK")
</pallas_src>

<mosaic_0001>
module attributes {stable_mosaic.version = 11 : i64} {
  func.func @_probe_kernel(%arg0: i32, %arg1: memref<8x128xf32, #tpu.memory_space<vmem>>, %arg2: memref<8x128xf32, #tpu.memory_space<vmem>>, %arg3: memref<8x128xf32, #tpu.memory_space<vmem>>) attributes {dimension_semantics = [#tpu.dimension_semantics<arbitrary>], iteration_bounds = array<i64: 2>, scalar_prefetch = 0 : i64, scratch_operands = 0 : i64, tpu.core_type = #tpu.core_type<tc>, window_params = [{transform_indices = @transform_0, window_bounds = array<i64: 8, 128>}, {pipeline_mode = #tpu.pipeline_mode<synchronous>, transform_indices = @transform_1, window_bounds = array<i64: 8, 128>}, {transform_indices = @transform_2, window_bounds = array<i64: 8, 128>}]} {
    %c0 = arith.constant 0 : index
    %c0_0 = arith.constant 0 : index
    %0 = vector.load %arg1[%c0, %c0_0] : memref<8x128xf32, #tpu.memory_space<vmem>>, vector<8x128xf32>
    %c0_1 = arith.constant 0 : index
    %c0_2 = arith.constant 0 : index
    %1 = vector.load %arg2[%c0_1, %c0_2] : memref<8x128xf32, #tpu.memory_space<vmem>>, vector<8x128xf32>
    %2 = arith.addf %0, %1 : vector<8x128xf32>
    %c0_3 = arith.constant 0 : index
    %c0_4 = arith.constant 0 : index
    %3 = vector.load %arg3[%c0_3, %c0_4] : memref<8x128xf32, #tpu.memory_space<vmem>>, vector<8x128xf32>
    tpu.vector_store %arg3[%c0_3, %c0_4], %2 {strides = array<i32>} : memref<8x128xf32, #tpu.memory_space<vmem>>, vector<8x128xf32>,
    return
  }
  func.func @transform_0(%arg0: i32) -> (i32, i32) {
    %c0_i32 = arith.constant 0 : i32
    %c0_i32_0 = arith.constant 0 : i32
    return %arg0, %c0_i32 : i32, i32
  }
  func.func @transform_1(%arg0: i32) -> (i32, i32) {
    %c0_i32 = arith.constant 0 : i32
    %c0_i32_0 = arith.constant 0 : i32
    %c0_i32_1 = arith.constant 0 : i32
    return %c0_i32, %c0_i32_0 : i32, i32
  }
  func.func @transform_2(%arg0: i32) -> (i32, i32) {
    %c0_i32 = arith.constant 0 : i32
    %c0_i32_0 = arith.constant 0 : i32
    return %arg0, %c0_i32 : i32, i32
  }
}

module attributes {stable_mosaic.version = 11 : i64} {
  func.func @_mlp_decoder_kernel(%arg0: i32, %arg1: memref<8x128xf32, #tpu.memory_space<vmem>>, %arg2: memref<128x128xbf16, #tpu.memory_space<vmem>>, %arg3: memref<1x128xf32, #tpu.memory_space<vmem>>, %arg4: memref<128x128xbf16, #tpu.memory_space<vmem>>, %arg5: memref<1x128xf32, #tpu.memory_space<vmem>>, %arg6: memref<8x128xf32, #tpu.memory_space<vmem>>) attributes {dimension_semantics = [#tpu.dimension_semantics<parallel>], iteration_bounds = array<i64: 1>, scalar_prefetch = 0 : i64, scratch_operands = 0 : i64, tpu.core_type = #tpu.core_type<tc>, window_params = [{transform_indices = @transform_0, window_bounds = array<i64: 8, 128>}, {pipeline_mode = #tpu.pipeline_mode<synchronous>, transform_indices = @transform_1, window_bounds = array<i64: 128, 128>}, {pipeline_mode = #tpu.pipeline_mode<synchronous>, transform_indices = @transform_2, window_bounds = array<i64: 1, 128>}, {pipeline_mode = #tpu.pipeline_mode<synchronous>, transform_indices = @transform_3, window_bounds = array<i64: 128, 128>}, {pipeline_mode = #tpu.pipeline_mode<synchronous>, transform_indices = @transform_4, window_bounds = array<i64: 1, 128>}, {transform_indices = @transform_5, window_bounds = array<i64: 8, 128>}]} {
    %c0 = arith.constant 0 : index
    %c0_0 = arith.constant 0 : index
    %0 = vector.load %arg1[%c0, %c0_0] : memref<8x128xf32, #tpu.memory_space<vmem>>, vector<8x128xf32>
    %1 = arith.truncf %0 : vector<8x128xf32> to vector<8x128xbf16>
    %c0_1 = arith.constant 0 : index
    %c0_2 = arith.constant 0 : index
    %2 = vector.load %arg2[%c0_1, %c0_2] : memref<128x128xbf16, #tpu.memory_space<vmem>>, vector<128x128xbf16>
    %cst = arith.constant dense<0.000000e+00> : vector<8x128xf32>
    %3 = tpu.matmul %1, %2, %cst {dimension_numbers = #tpu.dot_dimension_numbers<[1], [0], [0], [1], [0, 0, 1, 1], [], []>} : vector<8x128xbf16>, vector<128x128xbf16>, vector<8x128xf32> -> vector<8x128xf32>
    %c0_3 = arith.constant 0 : index
    %c0_4 = arith.constant 0 : index
    %4 = vector.load %arg3[%c0_3, %c0_4] : memref<1x128xf32, #tpu.memory_space<vmem>>, vector<1x128xf32>
    %5 = vector.broadcast %4 : vector<1x128xf32> to vector<8x128xf32>
    %6 = arith.addf %3, %5 : vector<8x128xf32>
    %cst_5 = arith.constant 0.000000e+00 : f32
    %7 = vector.broadcast %cst_5 : f32 to vector<8x128xf32>
    %8 = arith.maximumf %6, %7 : vector<8x128xf32>
    %9 = arith.truncf %8 : vector<8x128xf32> to vector<8x128xbf16>
    %c0_6 = arith.constant 0 : index
    %c0_7 = arith.constant 0 : index
    %10 = vector.load %arg4[%c0_6, %c0_7] : memref<128x128xbf16, #tpu.memory_space<vmem>>, vector<128x128xbf16>
    %cst_8 = arith.constant dense<0.000000e+00> : vector<8x128xf32>
    %11 = tpu.matmul %9, %10, %cst_8 {dimension_numbers = #tpu.dot_dimension_numbers<[1], [0], [0], [1], [0, 0, 1, 1], [], []>} : vector<8x128xbf16>, vector<128x128xbf16>, vector<8x128xf32> -> vector<8x128xf32>
    %c0_9 = arith.constant 0 : index
    %c0_10 = arith.constant 0 : index
    %12 = vector.load %arg5[%c0_9, %c0_10] : memref<1x128xf32, #tpu.memory_space<vmem>>, vector<1x128xf32>
    %13 = vector.broadcast %12 : vector<1x128xf32> to vector<8x128xf32>
    %14 = arith.addf %11, %13 : vector<8x128xf32>
    %c0_11 = arith.constant 0 : index
    %c0_12 = arith.constant 0 : index
    %15 = vector.load %arg6[%c0_11, %c0_12] : memref<8x128xf32, #tpu.memory_space<vmem>>, vector<8x128xf32>
    tpu.vector_store %arg6[%c0_11, %c0_12], %14 {strides = array<i32>} : memref<8x128xf32, #tpu.memory_space<vmem>>, vector<8x128xf32>,
    return
  }
  func.func @transform_0(%arg0: i32) -> (i32, i32) {
    %c0_i32 = arith.constant 0 : i32
    %c0_i32_0 = arith.constant 0 : i32
    return %arg0, %c0_i32 : i32, i32
  }
  func.func @transform_1(%arg0: i32) -> (i32, i32) {
    %c0_i32 = arith.constant 0 : i32
    %c0_i32_0 = arith.constant 0 : i32
    %c0_i32_1 = arith.constant 0 : i32
    return %c0_i32, %c0_i32_0 : i32, i32
  }
  func.func @transform_2(%arg0: i32) -> (i32, i32) {
    %c0_i32 = arith.constant 0 : i32
    %c0_i32_0 = arith.constant 0 : i32
    %c0_i32_1 = arith.constant 0 : i32
    return %c0_i32, %c0_i32_0 : i32, i32
  }
  func.func @transform_3(%arg0: i32) -> (i32, i32) {
    %c0_i32 = arith.constant 0 : i32
    %c0_i32_0 = arith.constant 0 : i32
    %c0_i32_1 = arith.constant 0 : i32
    return %c0_i32, %c0_i32_0 : i32, i32
  }
  func.func @transform_4(%arg0: i32) -> (i32, i32) {
    %c0_i32 = arith.constant 0 : i32
    %c0_i32_0 = arith.constant 0 : i32
    %c0_i32_1 = arith.constant 0 : i32
    return %c0_i32, %c0_i32_0 : i32, i32
  }
  func.func @transform_5(%arg0: i32) -> (i32, i32) {
    %c0_i32 = arith.constant 0 : i32
    %c0_i32_0 = arith.constant 0 : i32
    return %arg0, %c0_i32 : i32, i32
  }
}

</mosaic_0001>

<bundles_post_ra>
// kernel: tpu_custom_call.1
= control target key start
LH: loop header
LB: loop body
LE: loop exit
PB: predicated region body
PF: predicated region fallthrough
CT: control target
= control target key end

     0   :  { %7 = vsyncpa [#allocation3], 0  ;;  %s633_s0 = inlined_call_operand.hbm [shape: f32[16,128], index: 0, kind: input, shape index: {}]   ;;  %s634_s1 = inlined_call_operand.hbm [shape: f32[8,128], index: 1, kind: input, shape index: {}]   ;;  %s635_s2 = inlined_call_operand.hbm [shape: f32[16,128], index: 2, kind: output, shape index: {}]  }
   0x1   :  { %9 = vsyncpa [#allocation3 + $0x1], 0 }
   0x2   :  { %10 = vsyncpa [#allocation6], 0 }
   0x3   :  { %11 = vsyncpa [#allocation4], 0 }
   0x4   :  { %13 = vsyncpa [#allocation4 + $0x1], 0  ;;  %s495_s9 = smov 0   ;;  %s497_s10 = smov 0  }
   0x5   :  { %s499_s11 = smov 0   ;;  %s501_s12 = smov 0  }
   0x6 LB: > { %s516_s13 = sadd.s32 4294967295, %s477_s12   ;;  %s276_s14 = sadd.s32 4294967294, %s477_s12   ;;  %s477_s12 = sphi %s501_s12, %s645_s12   ;;  %s473_s11 = sphi %s499_s11, %s644_s11   ;;  %s469_s10 = sphi %s497_s10, %s643_s10   ;;  %s465_s9 = sphi %s495_s9, %s642_s9  }
   0x7   : > { %p39_p0 = scmp.ne.s32.totalorder %s469_s10, %s465_s9  ;;  %p40_p1 = scmp.eq.s32.totalorder %s516_s13, 0 }
   0x8   : > { %p84_p2 = scmp.eq.s32.totalorder %s516_s13, 1  ;;  %p90_p3 = scmp.eq.s32.totalorder %s276_s14, 1 }
   0x9   : > { %p525_p4 = por %p40_p1, %p39_p0  ;;  %p277_p5 = scmp.ge.s32.totalorder %s477_s12, 1 }
   0xa   : > { %p530_p6 = por %p90_p3, %p39_p0  ;;  %p97_p7 = scmp.lt.s32.totalorder %s477_s12, 3 }
   0xb   : > { %s109_s19 = sshll.u32 %s634_s1, 4  ;;  %s479_s21 = smov [#allocation5]   ;;  %s110_s19 = int_to_ptr.hbm [resolvable:$true] %s109_s19 }
   0xc   : > { %p538_p8 = pnand %p277_p5, %p97_p7  ;;  %s111_s22 = sshll.u32 %s479_s21, 4  ;;  %s112_s22 = int_to_ptr.vmem [resolvable:$true] %s111_s22 }
   0xd   : > { %s548_s23 = sadd.s32 1, %s477_s12   ;;  %s26_s24 = sadd.s32 1, %s473_s11 }
   0xe   : > { %p298_p10 = pneg %p538_p8  ;;  %s23_s25 = ssub.s32 %s477_s12, %s548_s23 }
   0xf   : > { %p24_p12 = scmp.eq.s32.totalorder %s23_s25, 0  ;;  %p33_p13 = scmp.ne.s32.totalorder %s473_s11, %s469_s10 }
  0x10   : > { %p299_p11 = pnand %p298_p10, %p40_p1  ;;  %p34_p0 = scmp.eq.s32.totalorder %s477_s12, 0 }
  0x11   : > { %s557_s26 = scalar_select %p24_p12, %s473_s11, %s26_s24  }
  0x12   : > { %301 = dma.hbm_to_vmem [thread:$0]  (!%p299_p11), %s110_s19, 128, %s112_s22, [#allocation6]  }
  0x13   : > { %p561_p3 = por %p84_p2, %p33_p13  ;;  %p311_p5 = scmp.lt.s32.totalorder %s477_s12, 2 }
  0x14   : > { %s122_s28 = sand.u32 1, %s473_s11   ;;  %s281_s29 = sshll.u32 %s477_s12, 3 }
  0x15   : > { %p35_p7 = por %p34_p0, %p33_p13  ;;  %s280_s30 = sshll.u32 %s122_s28, 3 }
  0x16   : > { %s130_s5 = scalar_lea.hbm %s633_s0, %s281_s29  ;;  %s126_s7 = scalar_lea.vmem [#allocation2], %s280_s30 }
  0x17   : > { %s132_s6 = sshll.u32 %s130_s5, 4  ;;  %s134_s8 = sshll.u32 %s126_s7, 4  ;;  %s133_s6 = int_to_ptr.hbm [resolvable:$true] %s132_s6  ;;  %s135_s8 = int_to_ptr.vmem [resolvable:$true] %s134_s8 }
  0x18   : > { %p571_p10 = pnand %p311_p5, %p35_p7  ;;  %s123_s17 = scalar_lea.sflag [#allocation3], %s122_s28 }
  0x19   : > { %s377_s18 = sshra.s32 %s133_s6, 4  ;;  %s384_s24 = scalar_lea.hbm %s633_s0, 16  ;;  %s378_s18 = int_to_ptr.hbm [resolvable:$true] %s377_s18 }
  0x1a   : > { %s379_s19 = scalar_lea.hbm %s378_s18, 8  ;;  %p381_p11 = pneg %p571_p10 }
  0x1b   : > { %p380_p2 = scmp.ne.s32.totalorder %s378_s18, %s379_s19  ;;  %p385_p0 = scmp.lt.s32.totalorder %s378_s18, %s633_s0 }
  0x1c   : > { %p386_p5 = scmp.lt.s32.totalorder %s384_s24, %s379_s19 }
  0x1d   : > { %p382_p12 = pnand %p381_p11, %p380_p2 }
  0x1e   : > { %p387_p7 = por %p386_p5, %p385_p0 }
  0x1f   : > { %p383_p13 = pneg %p382_p12 }
  0x21   : > { %p388_p9 = pnand %p387_p7, %p383_p13 }
  0x23   : > { %391 = shalt.err (!%p388_p9)
}
  0x24   : > { %305 = dma.hbm_to_vmem [thread:$0]  (!%p571_p10), %s133_s6, 128, %s135_s8, %s123_s17  }
  0x25   : > { %143 = sbr.rel (%p538_p8) target bundleno = 60 (0x3c), region = 28  ;;  %s588_s28 = sand.u32 (!%p538_p8), 1, %s469_s10  }
  0x26   : > { %s283_s30 = sshll.u32 (!%p538_p8), %s588_s28, 3  ;;  %s146_s3 = scalar_lea.sflag (!%p538_p8), [#allocation3], %s588_s28 }
  0x27   : > { %s149_s4 = scalar_lea.vmem (!%p538_p8), [#allocation2], %s283_s30 }
  0x2a   : > { %452 = dma.done.wait (%p525_p4), %s146_s3, 128  }
  0x2b   : > { %454 = vsyncadd (%p525_p4), %s146_s3, 4294967168 }
  0x2c   : > { %456 = dma.done.wait (%p40_p1), [#allocation6], 128  }
  0x2d   : > { %458 = vsyncadd (%p40_p1), [#allocation6], 4294967168  ;;  %s287_s20 = sshll.u32 %s516_s13, 3  ;;  %s175_s8 = scalar_lea.vmem [#allocation7], %s283_s30  ;;  %v176_v0 = vld [vmem:[%s149_s4] sm:$0xff]  ;;  %v177_v1 = vld [vmem:[#allocation5] sm:$0xff] }
  0x2e   : > { %s191_s7 = scalar_lea.hbm %s635_s2, %s287_s20  ;;  %s193_s14 = sshll.u32 %s175_s8, 4  ;;  %v178_v2 = vadd.f32 %v177_v1, %v176_v0  ;;  %s194_s14 = int_to_ptr.vmem [resolvable:$true] %s193_s14 }
  0x2f   : > { %s195_s17 = sshll.u32 %s191_s7, 4  ;;  %s181_s15 = scalar_lea.sflag [#allocation4], %s588_s28  ;;  %s196_s17 = int_to_ptr.hbm [resolvable:$true] %s195_s17 }
  0x30   : > { %179 = vst [vmem:[%s175_s8] sm:$0xff] %v178_v2  ;;  %s421_s18 = sshra.s32 %s196_s17, 4  ;;  %s427_s22 = scalar_lea.hbm %s635_s2, 16  ;;  %s422_s18 = int_to_ptr.hbm [resolvable:$true] %s421_s18 }
  0x31   : > { %s423_s19 = scalar_lea.hbm %s422_s18, 8  ;;  %p428_p9 = scmp.lt.s32.totalorder %s422_s18, %s635_s2 }
  0x32   : > { %p424_p1 = scmp.ne.s32.totalorder %s422_s18, %s423_s19  ;;  %p429_p10 = scmp.lt.s32.totalorder %s427_s22, %s423_s19 }
  0x34   : > { %p425_p4 = pnand %p424_p1, %p561_p3  ;;  %p430_p2 = por %p429_p10, %p428_p9 }
  0x36   : > { %p426_p8 = pneg %p425_p4 }
  0x38   : > { %p431_p11 = pnand %p430_p2, %p426_p8 }
  0x3a   : > { %434 = shalt.err (!%p431_p11)
}
  0x3b   : > { %296 = dma.vmem_to_hbm [thread:$0]  (%p561_p3), %s194_s14, 128, %s196_s17, %s181_s15  }
  0x3c PF: > { %s207_s29 = sand.u32 1, %s465_s9   ;;  %p641_p12 = scmp.ge.s32.totalorder %s477_s12, 2 }
  0x3d   : > { %s208_s28 = scalar_lea.sflag [#allocation4], %s207_s29 }
  0x3e   : > { %p307_p13 = pnand %p641_p12, %p530_p6 }
  0x40   : > { %p308_p0 = pneg %p307_p13 }
  0x42   : > { %460 = dma.done.wait (%p308_p0), %s208_s28, 128  }
  0x43   : > { %462 = vsyncadd (%p308_p0), %s208_s28, 4294967168  ;;  %p16_p5 = scmp.ge.s32.totalorder %s548_s23, 4   ;;  %s642_s9 = smov %s469_s10 }
  0x44   : > { %s643_s10 = smov %s473_s11  ;;  %s644_s11 = smov %s557_s26 }
  0x45   : > { %s645_s12 = smov %s548_s23  ;;  %18 = sbr.rel (!%p16_p5) target bundleno = 6 (0x6), region = 77 }
  0x4a   :  { %214 = vsyncpa [#allocation3], 1 }
  0x4b   :  { %216 = vsyncpa [#allocation3 + $0x1], 1 }
  0x4c   :  { %217 = vsyncpa [#allocation6], 1 }
  0x4d   :  { %218 = vsyncpa [#allocation4], 1 }
  0x4e   :  { %220 = vsyncpa [#allocation4 + $0x1], 1 }

// kernel: _mlp_forward_impl.1
= control target key start
LH: loop header
LB: loop body
LE: loop exit
PB: predicated region body
PF: predicated region fallthrough
CT: control target
= control target key end

     0   :  { %10 = vsyncpa [#allocation3], 0  ;;  %s456_s0 = inlined_call_operand.vmem [shape: f32[8,128], index: 0, kind: input, shape index: {}]   ;;  %s457_s1 = inlined_call_operand.hbm [shape: bf16[128,128], index: 1, kind: input, shape index: {}]   ;;  %s458_s2 = inlined_call_operand.vmem [shape: f32[1,128], index: 2, kind: input, shape index: {}]   ;;  %s459_s3 = inlined_call_operand.hbm [shape: bf16[128,128], index: 3, kind: input, shape index: {}]   ;;  %s460_s4 = inlined_call_operand.vmem [shape: f32[1,128], index: 4, kind: input, shape index: {}]   ;;  %s461_s5 = inlined_call_operand.hbm [shape: f32[8,128], index: 5, kind: output, shape index: {}]  }
   0x1   :  { %11 = vsyncpa [#allocation6], 0 }
   0x2   :  { %12 = vsyncpa [#allocation4], 0  ;;  %s19_s20 = sshll.u32 %s457_s1, 4  ;;  %s403_s21 = smov [#allocation2]   ;;  %s20_s20 = int_to_ptr.hbm [resolvable:$true] %s19_s20 }
   0x3   :  { %s21_s22 = sshll.u32 %s403_s21, 4  ;;  %s34_s25 = sshll.u32 %s459_s3, 4  ;;  %s22_s22 = int_to_ptr.vmem [resolvable:$true] %s21_s22  ;;  %s35_s25 = int_to_ptr.hbm [resolvable:$true] %s34_s25 }
   0x4   :  { %s404_s26 = smov 64   ;;  %s405_s27 = smov 4  }
   0x5   :  { %27 = dma.hbm_to_vmem [thread:$0]  %s20_s20, 1024, %s22_s22, [#allocation3], %s404_s26, %s404_s26, %s405_s27  }
   0x6   :  { %s406_s28 = smov [#allocation5]  }
   0x7   :  { %s36_s29 = sshll.u32 %s406_s28, 4  ;;  %s37_s29 = int_to_ptr.vmem [resolvable:$true] %s36_s29 }
   0x8   :  { %42 = dma.hbm_to_vmem [thread:$0]  %s35_s25, 1024, %s37_s29, [#allocation6], %s404_s26, %s404_s26, %s405_s27  }
   0x9   :  { %397 = dma.done.wait [#allocation3], 1024  }
   0xa   :  { %398 = vsyncadd [#allocation3], 4294966272 }
   0xb   :  { %399 = dma.done.wait [#allocation6], 1024  }
   0xc   :  { %400 = vsyncadd [#allocation6], 4294966272  ;;  %v309_v0 = vld [vmem:[#allocation2 + $0x38] sm:$0xff]  ;;  %v308_v1 = vld [vmem:[#allocation2 + $0x30] sm:$0xff]  ;;  %s227_s12 = sshll.u32 %s461_s5, 4  ;;  %s228_s12 = int_to_ptr.hbm [resolvable:$true] %s227_s12 }
   0xd   :  { %123 = vmatpush.bf16.msra.mxu0 %v309_v0  ;;  %v317_v2 = vld [vmem:[#allocation5 + $0x38] sm:$0xff]  ;;  %v316_v3 = vld [vmem:[#allocation5 + $0x30] sm:$0xff]  ;;  %v307_v4 = vld [vmem:[#allocation2 + $0x28] sm:$0xff] }
   0xe   :  { %206 = vmatpush.bf16.msra.mxu1 %v317_v2  ;;  %v315_v5 = vld [vmem:[#allocation5 + $0x28] sm:$0xff]  ;;  %v306_v6 = vld [vmem:[#allocation2 + $0x20] sm:$0xff]  ;;  %v305_v8 = vld [vmem:[#allocation2 + $0x18] sm:$0xff] }
   0xf   :  { %v314_v7 = vld [vmem:[#allocation5 + $0x20] sm:$0xff]  ;;  %v313_v9 = vld [vmem:[#allocation5 + $0x18] sm:$0xff]  ;;  %v304_v10 = vld [vmem:[#allocation2 + $0x10] sm:$0xff] }
  0x10   :  { %v312_v11 = vld [vmem:[#allocation5 + $0x10] sm:$0xff]  ;;  %v303_v12 = vld [vmem:[#allocation2 + $0x8] sm:$0xff]  ;;  %v302_v13 = vld [vmem:[#allocation2] sm:$0xff] }
  0x11   :  { %124 = vmatpush.bf16.msra.mxu0 %v308_v1  ;;  %v53_v14 = vld [vmem:[%s456_s0] sm:$0xff]  ;;  %v311_v16 = vld [vmem:[#allocation5 + $0x8] sm:$0xff]  ;;  %s407_s0 = smov [#allocation7]  }
  0x12   :  { %207 = vmatpush.bf16.msra.mxu1 %v316_v3  ;;  %v54_v15 = vpack.c.bf16 %v53_v14, %v53_v14  ;;  %v310_v17 = vld [vmem:[#allocation5] sm:$0xff]  ;;  %s225_s9 = sshll.u32 %s407_s0, 4  ;;  %s226_s9 = int_to_ptr.vmem [resolvable:$true] %s225_s9 }
  0x13   :  { %v323_v18 = vld [vmem:[%s458_s2] ss:$0 sm:$0xff] }
  0x14   :  { %v324_v24 = vld [vmem:[%s460_s4] ss:$0 sm:$0xff] }
  0x15   :  { %125 = vmatpush.bf16.msra.mxu0 %v307_v4 }
  0x16   :  { %208 = vmatpush.bf16.msra.mxu1 %v315_v5 }
  0x19   :  { %126 = vmatpush.bf16.msra.mxu0 %v306_v6 }
  0x1a   :  { %209 = vmatpush.bf16.msra.mxu1 %v314_v7 }
  0x1d   :  { %127 = vmatpush.bf16.msra.mxu0 %v305_v8 }
  0x1e   :  { %210 = vmatpush.bf16.msra.mxu1 %v313_v9 }
  0x21   :  { %128 = vmatpush.bf16.msra.mxu0 %v304_v10 }
  0x22   :  { %211 = vmatpush.bf16.msra.mxu1 %v312_v11 }
  0x25   :  { %129 = vmatpush.bf16.msra.mxu0 %v303_v12 }
  0x26   :  { %212 = vmatpush.bf16.msra.mxu1 %v311_v16 }
  0x29   :  { %130 = vmatpush.bf16.msra.mxu0 %v302_v13 }
  0x2a   :  { %213 = vmatpush.bf16.msra.mxu1 %v310_v17 }
  0x2c   :  { %131 = vmatmul.bf16.vlgmr.msra.gmra.mxu0 %v54_v15 }
  0xa9   :  { %v132_v19 = vpop.f32.mrf.mxu0 }
  0xaa   :  { %v133_v20 = vadd.f32 %v323_v18, %v132_v19 }
  0xac   :  { %v136_v21 = vmax.f32 %v133_v20, 0.0 }
  0xae   :  { %v137_v22 = vpack.c.bf16 %v136_v21, %v136_v21 }
  0xb0   :  { %214 = vmatmul.bf16.vlgmr.msra.gmra.mxu1 %v137_v22 }
  0xb1   :  { %v134_v23 = vpop.f32.mrf.mxu0 }
 0x12d   :  { %v215_v25 = vpop.f32.mrf.mxu1 }
 0x12e   :  { %v216_v26 = vadd.f32 %v324_v24, %v215_v25 }
 0x130   :  { %219 = vst [vmem:[#allocation7] sm:$0xff] %v216_v26 }
 0x131   :  { %230 = dma.vmem_to_hbm [thread:$0]  %s226_s9, 128, %s228_s12, [#allocation4]  }
 0x135   :  { %v217_v27 = vpop.f32.mrf.mxu1 }
 0x136   :  { %401 = dma.done.wait [#allocation4], 128  }
 0x137   :  { %402 = vsyncadd [#allocation4], 4294967168 }
 0x138   :  { %235 = vsyncpa [#allocation3], 1 }
 0x139   :  { %236 = vsyncpa [#allocation6], 1 }
 0x13a   :  { %237 = vsyncpa [#allocation4], 1 }

</bundles_post_ra>
